<compile_context>
chip_gen: v6e
topology: v6e:2x2x1
jax: 0.10.0
libtpu: 0.0.40
codegen_flags: <defaults>
</compile_context>

<pallas_src>
import math

import jax
import jax.numpy as jnp
from jax.experimental import pallas as pl
from jax.experimental.pallas import tpu as pltpu

_EPS = 1e-5
_LANES = 128


def _tpu_vmem_capacity_bytes():
    """Physical VMEM capacity (falls back to 128 MiB if the query is unavailable)."""
    cap = 128 << 20
    try:
        cap = int(pltpu.get_tpu_info().vmem_capacity_bytes)
    except Exception:
        pass
    return cap


def _pick_tile_m(m, vmem_cap_bytes):
    """Row tile that divides M exactly (full tiles keep BN stats exact); larger
    tiles on 128 MiB parts, smaller on v7x's 64 MiB."""
    target = 2048 if vmem_cap_bytes >= (96 << 20) else 1024
    tm = math.gcd(m, target)
    if tm % 8 != 0:          # fall back to a single full-extent block
        tm = m
    return tm


def conv_block_forward(x_nchw, weight_oihw, conv_bias, gamma, beta,
                       *, tile_m=None, matmul_dtype=jnp.bfloat16):
    """Pallas ConvBlock forward: (N, Cin, H, W) f32 -> (N, Cout, H, W) f32."""
    N, Cin, H, W = x_nchw.shape
    Cout, _, KH, KW = weight_oihw.shape
    # Conv bias is cancelled exactly by training-mode BN mean subtraction.
    del conv_bias

    M = N * H * W
    Kc = KH * KW * Cin
    sub = 16 if matmul_dtype == jnp.bfloat16 else 8
    Kp = ((Kc + sub - 1) // sub) * sub                # contraction dim, sublane-aligned
    Cp = ((Cout + _LANES - 1) // _LANES) * _LANES     # lane-dense output channels

    vmem_cap = _tpu_vmem_capacity_bytes()
    vmem_limit = min((vmem_cap // 4) * 3, 100 << 20)  # v7x -> 48 MiB, v5e/v6e -> 96 MiB
    if tile_m is None:
        tile_m = _pick_tile_m(M, vmem_cap)
    if M % tile_m or tile_m % 8:
        raise ValueError(f"tile_m={tile_m} must divide M={M} and be a multiple of 8")
    n_tiles = M // tile_m

    # --- wrapper-side im2col (see TODO: in-kernel halo assembly) -------------
    x = jnp.transpose(x_nchw, (0, 2, 3, 1)).astype(matmul_dtype)       # NHWC, bf16
    xp = jnp.pad(x, ((0, 0), (1, 1), (1, 1), (0, 0)))                  # pad=1 halo
    patches = jnp.concatenate(
        [xp[:, ky:ky + H, kx:kx + W, :] for ky in range(KH) for kx in range(KW)],
        axis=-1).reshape(M, Kc)                                         # (M, Kc)
    patches = jnp.pad(patches, ((0, 0), (0, Kp - Kc)))                  # (M, Kp)

    # Weight (Cout, Cin, KH, KW) -> (Kc, Cout) in (ky, kx, cin) order (matches the
    # patch column order), zero-padded to (Kp, Cp).
    wmat = jnp.transpose(weight_oihw, (2, 3, 1, 0)).reshape(Kc, Cout)
    wmat = jnp.pad(wmat.astype(matmul_dtype), ((0, Kp - Kc), (0, Cp - Cout)))
    g = jnp.pad(gamma.astype(jnp.float32).reshape(1, Cout), ((0, 0), (0, Cp - Cout)))
    b = jnp.pad(beta.astype(jnp.float32).reshape(1, Cout), ((0, 0), (0, Cp - Cout)))

    inv_m = 1.0 / float(M)

    def kernel(p_ref, w_ref, gamma_ref, beta_ref, o_ref,
               sum_ref, ssq_ref, scale_ref, shift_ref):
        phase = pl.program_id(0)   # 0: accumulate BN stats, 1: normalize + store
        i = pl.program_id(1)       # row-tile index

        @pl.when(phase == 0)
        def _stats_pass():
            @pl.when(i == 0)
            def _init():
                sum_ref[...] = jnp.zeros_like(sum_ref)
                ssq_ref[...] = jnp.zeros_like(ssq_ref)

            p = p_ref[...]
            wt = w_ref[...]
            acc = jnp.dot(p, wt, preferred_element_type=jnp.float32)   # (tm, Cp) f32
            # Per-channel sum as (colsum(P) @ W): runs on the MXU, so only the
            # sum-of-squares reduction streams `acc`.
            colsum = jnp.sum(p.astype(jnp.float32), axis=0, keepdims=True)  # (1, Kp)
            sum_ref[...] += jnp.dot(colsum, wt.astype(jnp.float32),
                                    preferred_element_type=jnp.float32)
            ssq_ref[...] += jnp.sum(acc * acc, axis=0, keepdims=True)

        @pl.when(phase == 1)
        def _store_pass():
            @pl.when(i == 0)
            def _finalize_stats():
                mean = sum_ref[...] * inv_m
                var = jnp.maximum(ssq_ref[...] * inv_m - mean * mean, 0.0)
                inv_std = jax.lax.rsqrt(var + _EPS)
                scale = gamma_ref[...] * inv_std
                scale_ref[...] = scale
                shift_ref[...] = beta_ref[...] - mean * scale

            acc = jnp.dot(p_ref[...], w_ref[...],
                          preferred_element_type=jnp.float32)           # recompute conv
            o_ref[...] = jnp.maximum(
                acc * scale_ref[...] + shift_ref[...], 0.0).astype(o_ref.dtype)

    out2d = pl.pallas_call(
        kernel,
        out_shape=jax.ShapeDtypeStruct((M, Cp), jnp.float32),
        grid_spec=pltpu.PrefetchScalarGridSpec(
            num_scalar_prefetch=0,
            grid=(2, n_tiles),                           # (phase, row tile)
            in_specs=[
                pl.BlockSpec((tile_m, Kp), lambda p, i: (i, 0)),   # patches tile
                pl.BlockSpec((Kp, Cp), lambda p, i: (0, 0)),       # weight (resident)
                pl.BlockSpec((1, Cp), lambda p, i: (0, 0)),        # gamma
                pl.BlockSpec((1, Cp), lambda p, i: (0, 0)),        # beta
            ],
            # Block index i*phase: during the stats phase the output block index
            # stays at 0 and is never flushed, so every output block is written to
            # HBM exactly once (by the normalize phase).
            out_specs=pl.BlockSpec((tile_m, Cp), lambda p, i: (i * p, 0)),
            scratch_shapes=[
                pltpu.VMEM((1, Cp), jnp.float32),   # per-channel sum
                pltpu.VMEM((1, Cp), jnp.float32),   # per-channel sum of squares
                pltpu.VMEM((1, Cp), jnp.float32),   # folded BN scale
                pltpu.VMEM((1, Cp), jnp.float32),   # folded BN shift
            ],
        ),
        compiler_params=pltpu.CompilerParams(
            dimension_semantics=("arbitrary", "arbitrary"),
            vmem_limit_bytes=vmem_limit),
    )(patches, wmat, g, b)

    # Layout plumbing back to NCHW (XLA).
    out = out2d[:, :Cout].reshape(N, H, W, Cout)
    return jnp.transpose(out, (0, 3, 1, 2))


def _reference(x, weight, conv_bias, gamma, beta):
    """Pure-JAX f32 reference: Conv2d -> training-mode BatchNorm2d -> ReLU (NCHW)."""
    y = jax.lax.conv_general_dilated(
        x, weight, window_strides=(1, 1), padding=((1, 1), (1, 1)),
        dimension_numbers=("NCHW", "OIHW", "NCHW"))
    y = y + conv_bias.reshape(1, -1, 1, 1)
    mean = jnp.mean(y, axis=(0, 2, 3), keepdims=True)
    var = jnp.mean((y - mean) ** 2, axis=(0, 2, 3), keepdims=True)
    y = (y - mean) * jax.lax.rsqrt(var + _EPS)
    y = y * gamma.reshape(1, -1, 1, 1) + beta.reshape(1, -1, 1, 1)
    return jnp.maximum(y, 0.0)


if __name__ == "__main__":
    key = jax.random.PRNGKey(0)
    k_x, k_w, k_cb, k_g, k_b = jax.random.split(key, 5)

    N, Cin, H, W = 2, 4, 16, 16
    Cout, K = 8, 3

    x = jax.random.normal(k_x, (N, Cin, H, W), jnp.float32)
    weight = jax.random.normal(k_w, (Cout, Cin, K, K), jnp.float32) * 0.1
    conv_bias = jax.random.normal(k_cb, (Cout,), jnp.float32) * 0.1
    gamma = 1.0 + 0.1 * jax.random.normal(k_g, (Cout,), jnp.float32)
    beta = 0.1 * jax.random.normal(k_b, (Cout,), jnp.float32)

    # tile_m=128 -> 4 row tiles x 2 phases: exercises the tiled two-pass BN path.
    out = conv_block_forward(x, weight, conv_bias, gamma, beta, tile_m=128)
    out = jax.block_until_ready(out)

    ref = jax.block_until_ready(_reference(x, weight, conv_bias, gamma, beta))
    assert out.shape == (N, Cout, H, W), out.shape
    # Tolerance loosened for bf16 MXU operands (f32 accumulation / epilogue).
    max_err = float(jnp.max(jnp.abs(out - ref)))
    assert jnp.allclose(out, ref, rtol=5e-2, atol=5e-2), max_err

    print("KERNEL_OK")
</pallas_src>

<mosaic_0001>
module attributes {stable_mosaic.version = 11 : i64} {
  func.func @kernel(%arg0: i32, %arg1: i32, %arg2: memref<128x48xbf16, #tpu.memory_space<vmem>>, %arg3: memref<48x128xbf16, #tpu.memory_space<vmem>>, %arg4: memref<1x128xf32, #tpu.memory_space<vmem>>, %arg5: memref<1x128xf32, #tpu.memory_space<vmem>>, %arg6: memref<128x128xf32, #tpu.memory_space<vmem>>, %arg7: memref<1x128xf32, #tpu.memory_space<vmem>>, %arg8: memref<1x128xf32, #tpu.memory_space<vmem>>, %arg9: memref<1x128xf32, #tpu.memory_space<vmem>>, %arg10: memref<1x128xf32, #tpu.memory_space<vmem>>) attributes {dimension_semantics = [#tpu.dimension_semantics<arbitrary>, #tpu.dimension_semantics<arbitrary>], iteration_bounds = array<i64: 2, 4>, scalar_prefetch = 0 : i64, scratch_operands = 4 : i64, tpu.core_type = #tpu.core_type<tc>, window_params = [{transform_indices = @transform_0, window_bounds = array<i64: 128, 48>}, {pipeline_mode = #tpu.pipeline_mode<synchronous>, transform_indices = @transform_1, window_bounds = array<i64: 48, 128>}, {pipeline_mode = #tpu.pipeline_mode<synchronous>, transform_indices = @transform_2, window_bounds = array<i64: 1, 128>}, {pipeline_mode = #tpu.pipeline_mode<synchronous>, transform_indices = @transform_3, window_bounds = array<i64: 1, 128>}, {transform_indices = @transform_4, window_bounds = array<i64: 128, 128>}]} {
    %c0_i32 = arith.constant 0 : i32
    %0 = arith.cmpi eq, %arg0, %c0_i32 : i32
    %1 = arith.extui %0 : i1 to i32
    %c0_i32_0 = arith.constant 0 : i32
    %2 = arith.cmpi ne, %1, %c0_i32_0 : i32
    scf.if %2 {
      %c0_i32_2 = arith.constant 0 : i32
      %6 = arith.cmpi eq, %arg1, %c0_i32_2 : i32
      %7 = arith.extui %6 : i1 to i32
      %c0_i32_3 = arith.constant 0 : i32
      %8 = arith.cmpi ne, %7, %c0_i32_3 : i32
      scf.if %8 {
        %cst_18 = arith.constant 0.000000e+00 : f32
        %26 = vector.broadcast %cst_18 : f32 to vector<1x128xf32>
        %c0_19 = arith.constant 0 : index
        %c0_20 = arith.constant 0 : index
        %27 = vector.load %arg7[%c0_19, %c0_20] : memref<1x128xf32, #tpu.memory_space<vmem>>, vector<1x128xf32>
        tpu.vector_store %arg7[%c0_19, %c0_20], %26 {strides = array<i32>} : memref<1x128xf32, #tpu.memory_space<vmem>>, vector<1x128xf32>,
        %cst_21 = arith.constant 0.000000e+00 : f32
        %28 = vector.broadcast %cst_21 : f32 to vector<1x128xf32>
        %c0_22 = arith.constant 0 : index
        %c0_23 = arith.constant 0 : index
        %29 = vector.load %arg8[%c0_22, %c0_23] : memref<1x128xf32, #tpu.memory_space<vmem>>, vector<1x128xf32>
        tpu.vector_store %arg8[%c0_22, %c0_23], %28 {strides = array<i32>} : memref<1x128xf32, #tpu.memory_space<vmem>>, vector<1x128xf32>,
      } else {
      }
      %c0 = arith.constant 0 : index
      %c0_4 = arith.constant 0 : index
      %9 = vector.load %arg2[%c0, %c0_4] : memref<128x48xbf16, #tpu.memory_space<vmem>>, vector<128x48xbf16>
      %c0_5 = arith.constant 0 : index
      %c0_6 = arith.constant 0 : index
      %10 = vector.load %arg3[%c0_5, %c0_6] : memref<48x128xbf16, #tpu.memory_space<vmem>>, vector<48x128xbf16>
      %cst = arith.constant dense<0.000000e+00> : vector<128x128xf32>
      %11 = tpu.matmul %9, %10, %cst {dimension_numbers = #tpu.dot_dimension_numbers<[1], [0], [0], [1], [0, 0, 1, 1], [], []>} : vector<128x48xbf16>, vector<48x128xbf16>, vector<128x128xf32> -> vector<128x128xf32>
      %12 = arith.extf %9 : vector<128x48xbf16> to vector<128x48xf32>
      %cst_7 = arith.constant dense<0.000000e+00> : vector<48xf32>
      %13 = vector.multi_reduction <add>, %12, %cst_7 [0] : vector<128x48xf32> to vector<48xf32>
      %14 = vector.shape_cast %13 : vector<48xf32> to vector<1x48xf32>
      %c0_8 = arith.constant 0 : index
      %c0_9 = arith.constant 0 : index
      %15 = vector.load %arg7[%c0_8, %c0_9] : memref<1x128xf32, #tpu.memory_space<vmem>>, vector<1x128xf32>
      %16 = arith.extf %10 : vector<48x128xbf16> to vector<48x128xf32>
      %cst_10 = arith.constant dense<0.000000e+00> : vector<1x128xf32>
      %17 = tpu.matmul %14, %16, %cst_10 {dimension_numbers = #tpu.dot_dimension_numbers<[1], [0], [0], [1], [0, 0, 1, 1], [], []>} : vector<1x48xf32>, vector<48x128xf32>, vector<1x128xf32> -> vector<1x128xf32>
      %18 = arith.addf %15, %17 : vector<1x128xf32>
      %c0_11 = arith.constant 0 : index
      %c0_12 = arith.constant 0 : index
      %19 = vector.load %arg7[%c0_11, %c0_12] : memref<1x128xf32, #tpu.memory_space<vmem>>, vector<1x128xf32>
      tpu.vector_store %arg7[%c0_11, %c0_12], %18 {strides = array<i32>} : memref<1x128xf32, #tpu.memory_space<vmem>>, vector<1x128xf32>,
      %c0_13 = arith.constant 0 : index
      %c0_14 = arith.constant 0 : index
      %20 = vector.load %arg8[%c0_13, %c0_14] : memref<1x128xf32, #tpu.memory_space<vmem>>, vector<1x128xf32>
      %21 = arith.mulf %11, %11 : vector<128x128xf32>
      %cst_15 = arith.constant dense<0.000000e+00> : vector<128xf32>
      %22 = vector.multi_reduction <add>, %21, %cst_15 [0] : vector<128x128xf32> to vector<128xf32>
      %23 = vector.shape_cast %22 : vector<128xf32> to vector<1x128xf32>
      %24 = arith.addf %20, %23 : vector<1x128xf32>
      %c0_16 = arith.constant 0 : index
      %c0_17 = arith.constant 0 : index
      %25 = vector.load %arg8[%c0_16, %c0_17] : memref<1x128xf32, #tpu.memory_space<vmem>>, vector<1x128xf32>
      tpu.vector_store %arg8[%c0_16, %c0_17], %24 {strides = array<i32>} : memref<1x128xf32, #tpu.memory_space<vmem>>, vector<1x128xf32>,
    } else {
    }
    %c1_i32 = arith.constant 1 : i32
    %3 = arith.cmpi eq, %arg0, %c1_i32 : i32
    %4 = arith.extui %3 : i1 to i32
    %c0_i32_1 = arith.constant 0 : i32
    %5 = arith.cmpi ne, %4, %c0_i32_1 : i32
    scf.if %5 {
      %c0_i32_2 = arith.constant 0 : i32
      %6 = arith.cmpi eq, %arg1, %c0_i32_2 : i32
      %7 = arith.extui %6 : i1 to i32
      %c0_i32_3 = arith.constant 0 : i32
      %8 = arith.cmpi ne, %7, %c0_i32_3 : i32
      scf.if %8 {
        %c0_14 = arith.constant 0 : index
        %c0_15 = arith.constant 0 : index
        %21 = vector.load %arg7[%c0_14, %c0_15] : memref<1x128xf32, #tpu.memory_space<vmem>>, vector<1x128xf32>
        %cst_16 = arith.constant 0.001953125 : f32
        %22 = vector.broadcast %cst_16 : f32 to vector<1x128xf32>
        %23 = arith.mulf %21, %22 : vector<1x128xf32>
        %c0_17 = arith.constant 0 : index
        %c0_18 = arith.constant 0 : index
        %24 = vector.load %arg8[%c0_17, %c0_18] : memref<1x128xf32, #tpu.memory_space<vmem>>, vector<1x128xf32>
        %cst_19 = arith.constant 0.001953125 : f32
        %25 = vector.broadcast %cst_19 : f32 to vector<1x128xf32>
        %26 = arith.mulf %24, %25 : vector<1x128xf32>
        %27 = arith.mulf %23, %23 : vector<1x128xf32>
        %28 = arith.subf %26, %27 : vector<1x128xf32>
        %cst_20 = arith.constant 0.000000e+00 : f32
        %29 = vector.broadcast %cst_20 : f32 to vector<1x128xf32>
        %30 = arith.maximumf %28, %29 : vector<1x128xf32>
        %cst_21 = arith.constant 9.99999974E-6 : f32
        %31 = vector.broadcast %cst_21 : f32 to vector<1x128xf32>
        %32 = arith.addf %30, %31 : vector<1x128xf32>
        %33 = math.rsqrt %32 : vector<1x128xf32>
        %c0_22 = arith.constant 0 : index
        %c0_23 = arith.constant 0 : index
        %34 = vector.load %arg4[%c0_22, %c0_23] : memref<1x128xf32, #tpu.memory_space<vmem>>, vector<1x128xf32>
        %35 = arith.mulf %34, %33 : vector<1x128xf32>
        %c0_24 = arith.constant 0 : index
        %c0_25 = arith.constant 0 : index
        %36 = vector.load %arg9[%c0_24, %c0_25] : memref<1x128xf32, #tpu.memory_space<vmem>>, vector<1x128xf32>
        tpu.vector_store %arg9[%c0_24, %c0_25], %35 {strides = array<i32>} : memref<1x128xf32, #tpu.memory_space<vmem>>, vector<1x128xf32>,
        %c0_26 = arith.constant 0 : index
        %c0_27 = arith.constant 0 : index
        %37 = vector.load %arg5[%c0_26, %c0_27] : memref<1x128xf32, #tpu.memory_space<vmem>>, vector<1x128xf32>
        %38 = arith.mulf %23, %35 : vector<1x128xf32>
        %39 = arith.subf %37, %38 : vector<1x128xf32>
        %c0_28 = arith.constant 0 : index
        %c0_29 = arith.constant 0 : index
        %40 = vector.load %arg10[%c0_28, %c0_29] : memref<1x128xf32, #tpu.memory_space<vmem>>, vector<1x128xf32>
        tpu.vector_store %arg10[%c0_28, %c0_29], %39 {strides = array<i32>} : memref<1x128xf32, #tpu.memory_space<vmem>>, vector<1x128xf32>,
      } else {
      }
      %c0 = arith.constant 0 : index
      %c0_4 = arith.constant 0 : index
      %9 = vector.load %arg2[%c0, %c0_4] : memref<128x48xbf16, #tpu.memory_space<vmem>>, vector<128x48xbf16>
      %c0_5 = arith.constant 0 : index
      %c0_6 = arith.constant 0 : index
      %10 = vector.load %arg3[%c0_5, %c0_6] : memref<48x128xbf16, #tpu.memory_space<vmem>>, vector<48x128xbf16>
      %cst = arith.constant dense<0.000000e+00> : vector<128x128xf32>
      %11 = tpu.matmul %9, %10, %cst {dimension_numbers = #tpu.dot_dimension_numbers<[1], [0], [0], [1], [0, 0, 1, 1], [], []>} : vector<128x48xbf16>, vector<48x128xbf16>, vector<128x128xf32> -> vector<128x128xf32>
      %c0_7 = arith.constant 0 : index
      %c0_8 = arith.constant 0 : index
      %12 = vector.load %arg9[%c0_7, %c0_8] : memref<1x128xf32, #tpu.memory_space<vmem>>, vector<1x128xf32>
      %13 = vector.broadcast %12 : vector<1x128xf32> to vector<128x128xf32>
      %14 = arith.mulf %11, %13 : vector<128x128xf32>
      %c0_9 = arith.constant 0 : index
      %c0_10 = arith.constant 0 : index
      %15 = vector.load %arg10[%c0_9, %c0_10] : memref<1x128xf32, #tpu.memory_space<vmem>>, vector<1x128xf32>
      %16 = vector.broadcast %15 : vector<1x128xf32> to vector<128x128xf32>
      %17 = arith.addf %14, %16 : vector<128x128xf32>
      %cst_11 = arith.constant 0.000000e+00 : f32
      %18 = vector.broadcast %cst_11 : f32 to vector<128x128xf32>
      %19 = arith.maximumf %17, %18 : vector<128x128xf32>
      %c0_12 = arith.constant 0 : index
      %c0_13 = arith.constant 0 : index
      %20 = vector.load %arg6[%c0_12, %c0_13] : memref<128x128xf32, #tpu.memory_space<vmem>>, vector<128x128xf32>
      tpu.vector_store %arg6[%c0_12, %c0_13], %19 {strides = array<i32>} : memref<128x128xf32, #tpu.memory_space<vmem>>, vector<128x128xf32>,
    } else {
    }
    return
  }
  func.func @transform_0(%arg0: i32, %arg1: i32) -> (i32, i32) {
    %c0_i32 = arith.constant 0 : i32
    %c0_i32_0 = arith.constant 0 : i32
    return %arg1, %c0_i32 : i32, i32
  }
  func.func @transform_1(%arg0: i32, %arg1: i32) -> (i32, i32) {
    %c0_i32 = arith.constant 0 : i32
    %c0_i32_0 = arith.constant 0 : i32
    %c0_i32_1 = arith.constant 0 : i32
    return %c0_i32, %c0_i32_0 : i32, i32
  }
  func.func @transform_2(%arg0: i32, %arg1: i32) -> (i32, i32) {
    %c0_i32 = arith.constant 0 : i32
    %c0_i32_0 = arith.constant 0 : i32
    %c0_i32_1 = arith.constant 0 : i32
    return %c0_i32, %c0_i32_0 : i32, i32
  }
  func.func @transform_3(%arg0: i32, %arg1: i32) -> (i32, i32) {
    %c0_i32 = arith.constant 0 : i32
    %c0_i32_0 = arith.constant 0 : i32
    %c0_i32_1 = arith.constant 0 : i32
    return %c0_i32, %c0_i32_0 : i32, i32
  }
  func.func @transform_4(%arg0: i32, %arg1: i32) -> (i32, i32) {
    %0 = arith.muli %arg1, %arg0 : i32
    %c0_i32 = arith.constant 0 : i32
    %c0_i32_0 = arith.constant 0 : i32
    return %0, %c0_i32 : i32, i32
  }
}

</mosaic_0001>

<bundles_post_ra>
// kernel: tpu_custom_call.1
= control target key start
LH: loop header
LB: loop body
LE: loop exit
PB: predicated region body
PF: predicated region fallthrough
CT: control target
= control target key end

     0   :  { %9 = vsyncpa [#allocation7], 0  ;;  %s1697_s0 = inlined_call_operand.vmem [shape: bf16[512,48], index: 0, kind: input, shape index: {}]   ;;  %s1698_s1 = inlined_call_operand.vmem [shape: bf16[48,128], index: 1, kind: input, shape index: {}]   ;;  %s1699_s2 = inlined_call_operand.vmem [shape: f32[1,128], index: 2, kind: input, shape index: {}]   ;;  %s1700_s3 = inlined_call_operand.vmem [shape: f32[1,128], index: 3, kind: input, shape index: {}]   ;;  %s1701_s4 = inlined_call_operand.hbm [shape: f32[512,128], index: 4, kind: output, shape index: {}]  }
   0x1   :  { %11 = vsyncpa [#allocation7 + $0x1], 0  ;;  %s1389_s15 = smov 0   ;;  %s1391_s16 = smov 0  }
   0x2   :  { %s1393_s17 = smov 0   ;;  %s1395_s18 = smov 0  }
   0x3   :  { %s1397_s19 = smov 0   ;;  %s1399_s20 = smov 0  }
   0x4   :  { %s1401_s21 = smov 0   ;;  %s1403_s22 = smov 0  }
   0x5 LB: > { %s994_s23 = sadd.s32 4294967295, %s1356_s22   ;;  %s995_s24 = sadd.s32 4294967294, %s1356_s22   ;;  %s1356_s22 = sphi %s1403_s22, %s17_s22   ;;  %s1352_s21 = sphi %s1401_s21, %s1710_s21   ;;  %s1348_s20 = sphi %s1399_s20, %s1709_s20   ;;  %s1344_s19 = sphi %s1397_s19, %s1708_s19   ;;  %s1340_s18 = sphi %s1395_s18, %s1707_s18   ;;  %s1336_s17 = sphi %s1393_s17, %s1706_s17   ;;  %s1332_s16 = sphi %s1391_s16, %s1705_s16   ;;  %s1328_s15 = sphi %s1389_s15, %s1704_s15  }
   0x6   : > { %s26_s25 = sadd.s32 1, %s1348_s20  ;;  %s29_s26 = sadd.s32 1, %s1352_s21 }
   0x7   : > { %p27_p0 = scmp.ge.s32.totalorder %s26_s25, 4  ;;  %s122_s27 = smul.u32 %s1348_s20, %s1352_s21 }
   0x8   : > { %p137_p1 = scmp.ne.s32.totalorder %s1336_s17, %s1332_s16  ;;  %p138_p2 = scmp.eq.s32.totalorder %s994_s23, 7 }
   0x9   : > { %s1712_s25 = smov (%p27_p0, %s26_s25), 0  ;;  %s1714_s26 = smov (!%p27_p0, %s29_s26), %s1352_s21 }
   0xa   : > { %p143_p3 = scmp.ne.s32.totalorder %s1332_s16, %s1328_s15  ;;  %p31_p4 = scmp.ge.s32.totalorder %s1714_s26, 2 }
   0xb   : > { %p144_p5 = scmp.eq.s32.totalorder %s995_s24, 7  ;;  %p1442_p6 = por %p138_p2, %p137_p1 }
   0xc   : > { %p998_p7 = scmp.ge.s32.totalorder %s1356_s22, 1  ;;  %s1716_s26 = smov (%p31_p4, %s1714_s26), 0 }
   0xd   : > { %p1449_p8 = por %p144_p5, %p143_p3  ;;  %p180_p9 = scmp.lt.s32.totalorder %s1356_s22, 9 }
   0xe   : > { %s123_s30 = smul.u32 %s1716_s26, %s1712_s25  ;;  %s127_s6 = sadd.s32 1, %s1336_s17 }
   0xf   : > { %p181_p10 = pnand %p998_p7, %p180_p9 }
  0x10   : > { %s124_s5 = ssub.s32 %s122_s27, %s123_s30  ;;  %s203_s8 = sand.u32 (!%p181_p10), 1, %s1332_s16  }
  0x11   : > { %p125_p11 = scmp.eq.s32.totalorder %s124_s5, 0  ;;  %184 = sbr.rel (%p181_p10) target bundleno = 590 (0x24e), region = 36 }
  0x12   : > { %s1000_s9 = sshll.u32 (!%p181_p10), %s1340_s18, 4  ;;  %s999_s10 = sshll.u32 (!%p181_p10), %s203_s8, 7 }
  0x13   : > { %s1458_s7 = scalar_select %p125_p11, %s1336_s17, %s127_s6  }
  0x14   : > { %p207_p12 = scmp.lt.s32.totalorder (!%p181_p10), %s1000_s9, 63  ;;  %s1469_s23 = scalar_lea.vmem (!%p181_p10), [#allocation6], %s999_s10 }
  0x15   : > { %p1002_p13 = scmp.ne.s32.totalorder (!%p181_p10), %s1344_s19, 0 }
  0x16   : > { %s1718_s9 = smov (!%p207_p12, %s1000_s9), 63  ;;  %p1003_p0 = scmp.ne.s32.totalorder (!%p1002_p13), %s1340_s18, 0 }
  0x17   : > { %s1001_s11 = sshll.u32 %s1718_s9, 2  ;;  %218 = sbr.rel (%p1002_p13) target bundleno = 294 (0x126), region = 40 }
  0x18   : > { %s1467_s14 = scalar_lea.vmem %s1697_s0, %s1001_s11 }
  0x1c   : > { %222 = sbr.rel (%p1003_p0) target bundleno = 35 (0x23), region = 44 }
  0x21   : > { %v1358_v0 = vmov 0.0  }
  0x22   : > { %223 = vst [vmem:[#allocation2] sm:$0x1] %v1358_v0  ;;  %224 = vst [vmem:[#allocation3] sm:$0x1] %v1358_v0 }
  0x23 PF: > { %v1476_v1 = vld [vmem:[%s1698_s1 + $0x10] sm:$0xff]   ;;  %v1481_v2 = vld [vmem:[%s1698_s1 + $0x8] sm:$0xff]   ;;  %v225_v3 = vld [vmem:[%s1467_s14] sm:$0xff]   ;;  %vm305_vm0 = vcmask 392192   ;;  %v1359_v35 = vmov 0.0   ;;  %vm1360_vm1 = vmmov 0  }
  0x24   : > { %v227_v4 = vld [vmem:[%s1467_s14 + $0x8] sm:$0xff]   ;;  %v1488_v5 = vld [vmem:[%s1698_s1] sm:$0xff]   ;;  %v427_v6 = vunpack.c.l.bf16 %v225_v3  ;;  %v428_v7 = vunpack.c.h.bf16 %v225_v3  ;;  %1082 = vmatprep.subr.bf16.mxu0 %v1476_v1  ;;  %1141 = vmatprep.subr.bf16.mxu1 %v1476_v1  ;;  %v229_v10 = vld [vmem:[%s1467_s14 + $0x10] sm:$0xff]   ;;  %v486_v32 = vunpack.c.h.bf16 %v1476_v1  ;;  %v485_v38 = vunpack.c.l.bf16 %v1476_v1 }
  0x25   : > { %v429_v8 = vunpack.c.l.bf16 %v227_v4  ;;  %v430_v9 = vunpack.c.h.bf16 %v227_v4  ;;  %1083 = vmatpush3.bf16.msra.mxu0 %v1476_v1  ;;  %1088 = vmatprep.mubr.msk.bf16.mxu0 %vm305_vm0, %v225_v3  ;;  %v431_v14 = vunpack.c.l.bf16 %v229_v10  ;;  %v432_v17 = vunpack.c.h.bf16 %v229_v10  ;;  %v1503_v18 = vld [vmem:[%s1467_s14 + $0x30] sm:$0xff]   ;;  %v231_v20 = vld [vmem:[%s1467_s14 + $0x18] sm:$0xff]   ;;  %v233_v28 = vld [vmem:[%s1467_s14 + $0x20] sm:$0xff]  }
  0x26   : > { %v443_v11 = vsel %vm305_vm0, %v427_v6, 0.0  ;;  %v444_v12 = vsel %vm305_vm0, %v428_v7, 0.0  ;;  %1084 = vmatprep.subr.bf16.mxu0 %v1481_v2  ;;  %1144 = vmatpush3.bf16.msra.mxu1 %v1476_v1  ;;  %v433_v22 = vunpack.c.l.bf16 %v231_v20  ;;  %v1511_v24 = vld [vmem:[%s1467_s14 + $0x38] sm:$0xff]   ;;  %v434_v26 = vunpack.c.h.bf16 %v231_v20  ;;  %v235_v37 = vld [vmem:[%s1467_s14 + $0x28] sm:$0xff]  }
  0x27   : > { %v446_v13 = vsel %vm305_vm0, %v429_v8, 0.0  ;;  %v445_v15 = vadd.f32 %v444_v12, %v443_v11  ;;  %v448_v16 = vsel %vm305_vm0, %v430_v9, 0.0  ;;  %1142 = vmatprep.subr.bf16.mxu1 %v1481_v2  ;;  %v450_v21 = vsel %vm305_vm0, %v431_v14, 0.0  ;;  %1100 = vmatprep.mubr.msk.bf16.mxu1 %vm305_vm0, %v1503_v18 }
  0x28   : > { %v452_v25 = vsel %vm305_vm0, %v432_v17, 0.0  ;;  %v454_v29 = vsel %vm305_vm0, %v433_v22, 0.0  ;;  %v435_v30 = vunpack.c.l.bf16 %v233_v28  ;;  %v456_v33 = vsel %vm305_vm0, %v434_v26, 0.0 }
  0x29   : > { %v447_v19 = vadd.f32 %v446_v13, %v445_v15  ;;  %1085 = vmatpush3.bf16.msra.mxu0 %v1481_v2  ;;  %v436_v34 = vunpack.c.h.bf16 %v233_v28  ;;  %v437_v40 = vunpack.c.l.bf16 %v235_v37  ;;  %v484_v42 = vunpack.c.h.bf16 %v1481_v2 }
  0x2a   : > { %1086 = vmatprep.subr.bf16.mxu0 %v1488_v5  ;;  %1145 = vmatpush3.bf16.msra.mxu1 %v1481_v2  ;;  %v458_v39 = vsel %vm305_vm0, %v435_v30, 0.0  ;;  %v438_v44 = vunpack.c.h.bf16 %v235_v37  ;;  %v483_v46 = vunpack.c.l.bf16 %v1481_v2  ;;  %v439_v47 = vunpack.c.l.bf16 %v1503_v18 }
  0x2b   : > { %v449_v23 = vadd.f32 %v448_v16, %v447_v19  ;;  %1143 = vmatprep.subr.bf16.mxu1 %v1488_v5  ;;  %v460_v43 = vsel %vm305_vm0, %v436_v34, 0.0  ;;  %v462_v48 = vsel %vm305_vm0, %v437_v40, 0.0  ;;  %v482_v50 = vunpack.c.h.bf16 %v1488_v5 }
  0x2c   : > { %v440_v51 = vunpack.c.h.bf16 %v1503_v18  ;;  %v464_v52 = vsel %vm305_vm0, %v438_v44, 0.0  ;;  %v481_v54 = vunpack.c.l.bf16 %v1488_v5  ;;  %v441_v55 = vunpack.c.l.bf16 %v1511_v24 }
  0x2d   : > { %v451_v27 = vadd.f32 %v450_v21, %v449_v23  ;;  %1087 = vmatpush3.bf16.msra.mxu0 %v1488_v5  ;;  %v466_v56 = vsel %vm305_vm0, %v439_v47, 0.0  ;;  %v442_v59 = vunpack.c.h.bf16 %v1511_v24 }
  0x2e   : > { %1146 = vmatpush3.bf16.msra.mxu1 %v1488_v5  ;;  %v468_v58 = vsel %vm305_vm0, %v440_v51, 0.0  ;;  %v470_v61 = vsel %vm305_vm0, %v441_v55, 0.0 }
  0x2f   : > { %v453_v31 = vadd.f32 %v452_v25, %v451_v27  ;;  %1104 = vmatprep.subr.mxu1 %v1359_v35  ;;  %v472_v63 = vsel %vm305_vm0, %v442_v59, 0.0 }
  0x30   : > { %1089 = vmatmul.mubr.msk.bf16.vlgmr.msra.gmra.mxu0 %vm305_vm0, %v227_v4 }
  0x31   : > { %v455_v36 = vadd.f32 %v454_v29, %v453_v31  ;;  %1092 = vmatprep.mubr.msk.bf16.mxu0 %vm305_vm0, %v229_v10  ;;  %1101 = vmatmul.mubr.msk.bf16.vlgmr.msra.gmra.mxu1 %vm305_vm0, %v1511_v24 }
  0x32   : > { %1105 = vmatpush3.msra.mxu1 %v486_v32  ;;  %1116 = vmatprep.mubr.msk.f32.mxu1 %vm1360_vm1, %v1359_v35 }
  0x33   : > { %v457_v41 = vadd.f32 %v456_v33, %v455_v36  ;;  %1106 = vmatprep.subr.mxu1 %v1359_v35 }
  0x34   : > { %1107 = vmatpush3.msra.mxu1 %v485_v38 }
  0x35   : > { %v459_v45 = vadd.f32 %v458_v39, %v457_v41  ;;  %1108 = vmatprep.subr.mxu1 %v1359_v35 }
  0x36   : > { %1109 = vmatpush3.msra.mxu1 %v484_v42 }
  0x37   : > { %v461_v49 = vadd.f32 %v460_v43, %v459_v45  ;;  %1110 = vmatprep.subr.mxu1 %v1359_v35 }
  0x38   : > { %1093 = vmatmul.mubr.msk.bf16.gmra.mxu0 %vm305_vm0, %v231_v20  ;;  %1111 = vmatpush3.msra.mxu1 %v483_v46 }
  0x39   : > { %v463_v53 = vadd.f32 %v462_v48, %v461_v49  ;;  %1096 = vmatprep.mubr.msk.bf16.mxu0 %vm305_vm0, %v233_v28  ;;  %1112 = vmatprep.subr.mxu1 %v1359_v35  ;;  %v480_v48 = vld [vmem:[#allocation2] sm:$0x1] }
  0x3a   : > { %1113 = vmatpush3.msra.mxu1 %v482_v50 }
  0x3b   : > { %v465_v57 = vadd.f32 %v464_v52, %v463_v53  ;;  %1114 = vmatprep.subr.mxu1 %v1359_v35 }
  0x3c   : > { %1115 = vmatpush3.msra.mxu1 %v481_v54 }
  0x3d   : > { %v467_v60 = vadd.f32 %v466_v56, %v465_v57 }
  0x3f   : > { %v469_v62 = vadd.f32 %v468_v58, %v467_v60 }
  0x40   : > { %1097 = vmatmul.mubr.msk.bf16.gmra.mxu0 %vm305_vm0, %v235_v37 }
  0x41   : > { %v471_v0 = vadd.f32 %v470_v61, %v469_v62 }
  0x43   : > { %v473_v1 = vadd.f32 %v472_v63, %v471_v0  ;;  %v562_v0 = vld [vmem:[#allocation3] sm:$0x1] }
  0x45   : > { %v474_v2 = vrot.slane %v473_v1, 4 }
  0x47   : > { %v475_v3 = vadd.f32 %v474_v2, %v473_v1 }
  0x49   : > { %v476_v4 = vrot.slane %v475_v3, 2 }
  0x4b   : > { %v477_v5 = vadd.f32 %v476_v4, %v475_v3 }
  0x4d   : > { %v478_v6 = vrot.slane %v477_v5, 1 }
  0x4f   : > { %v479_v7 = vadd.f32 %v478_v6, %v477_v5 }
  0x51   : > { %1117 = vmatmul.mubr.msk.f32.vlgmr.msra.gmra.mxu1 %vm305_vm0, %v479_v7 }
  0xf0   : > { %v1090_v8 = vpop.f32.mrf.mxu0 }
  0xf1   : > { %v565_v15 = vmul.f32 %v1090_v8, %v1090_v8  ;;  %v1102_v27 = vpop.f32.mrf.mxu1 }
  0xf2   : > { %v364_v9 = vpop.f32.mrf.mxu0  ;;  %v577_v52 = vmul.f32 %v1102_v27, %v1102_v27 }
  0xf3   : > { %v563_v12 = vmul.f32 %v364_v9, %v364_v9  ;;  %v412_v34 = vpop.f32.mrf.mxu1 }
  0xf4   : > { %v1091_v10 = vpop.f32.mrf.mxu0  ;;  %v575_v46 = vmul.f32 %v412_v34, %v412_v34 }
  0xf5   : > { %v566_v18 = vmul.f32 %v1091_v10, %v1091_v10  ;;  %v1103_v40 = vpop.f32.mrf.mxu1 }
  0xf6   : > { %v367_v11 = vpop.f32.mrf.mxu0  ;;  %v578_v56 = vmul.f32 %v1103_v40, %v1103_v40 }
  0xf7   : > { %v564_v13 = vmul.f32 %v367_v11, %v367_v11  ;;  %v415_v45 = vpop.f32.mrf.mxu1 }
  0xf8   : > { %v1094_v14 = vpop.f32.mrf.mxu0  ;;  %v576_v49 = vmul.f32 %v415_v45, %v415_v45 }
  0xf9   : > { %v579_v16 = vadd.f32 %v564_v13, %v563_v12  ;;  %v569_v28 = vmul.f32 %v1094_v14, %v1094_v14 }
  0xfa   : > { %v380_v17 = vpop.f32.mrf.mxu0 }
  0xfb   : > { %v580_v19 = vadd.f32 %v579_v16, %v565_v15  ;;  %v567_v21 = vmul.f32 %v380_v17, %v380_v17 }
  0xfc   : > { %v1095_v20 = vpop.f32.mrf.mxu0 }
  0xfd   : > { %v581_v22 = vadd.f32 %v580_v19, %v566_v18  ;;  %v570_v31 = vmul.f32 %v1095_v20, %v1095_v20 }
  0xfe   : > { %v383_v23 = vpop.f32.mrf.mxu0 }
  0xff   : > { %v582_v24 = vadd.f32 %v581_v22, %v567_v21  ;;  %v568_v25 = vmul.f32 %v383_v23, %v383_v23 }
 0x100   : > { %v1098_v26 = vpop.f32.mrf.mxu0 }
 0x101   : > { %v583_v29 = vadd.f32 %v582_v24, %v568_v25  ;;  %v573_v41 = vmul.f32 %v1098_v26, %v1098_v26 }
 0x102   : > { %v396_v30 = vpop.f32.mrf.mxu0 }
 0x103   : > { %v584_v32 = vadd.f32 %v583_v29, %v569_v28  ;;  %v571_v35 = vmul.f32 %v396_v30, %v396_v30 }
 0x104   : > { %v1099_v33 = vpop.f32.mrf.mxu0 }
 0x105   : > { %v585_v36 = vadd.f32 %v584_v32, %v570_v31  ;;  %v574_v43 = vmul.f32 %v1099_v33, %v1099_v33 }
 0x106   : > { %v399_v37 = vpop.f32.mrf.mxu0 }
 0x107   : > { %v586_v38 = vadd.f32 %v585_v36, %v571_v35  ;;  %v572_v39 = vmul.f32 %v399_v37, %v399_v37 }
 0x109   : > { %v587_v42 = vadd.f32 %v586_v38, %v572_v39 }
 0x10b   : > { %v588_v44 = vadd.f32 %v587_v42, %v573_v41 }
 0x10d   : > { %v589_v47 = vadd.f32 %v588_v44, %v574_v43 }
 0x10f   : > { %v590_v50 = vadd.f32 %v589_v47, %v575_v46 }
 0x111   : > { %v556_v51 = vpop.f32.mrf.mxu1  ;;  %v591_v53 = vadd.f32 %v590_v50, %v576_v49 }
 0x112   : > { %v560_v54 = vadd.f32 %v556_v51, %v480_v48 }
 0x113   : > { %v1118_v55 = vpop.f32.mrf.mxu1  ;;  %v592_v57 = vadd.f32 %v591_v53, %v577_v52 }
 0x114   : > { %561 = vst [vmem:[#allocation2] sm:$0x1] %v560_v54 }
 0x115   : > { %v593_v58 = vadd.f32 %v592_v57, %v578_v56 }
 0x117   : > { %v594_v59 = vrot.slane %v593_v58, 4 }
 0x119   : > { %v595_v60 = vadd.f32 %v594_v59, %v593_v58 }
 0x11b   : > { %v596_v61 = vrot.slane %v595_v60, 2 }
 0x11d   : > { %v597_v62 = vadd.f32 %v596_v61, %v595_v60 }
 0x11f   : > { %v598_v63 = vrot.slane %v597_v62, 1 }
 0x121   : > { %v599_v1 = vadd.f32 %v598_v63, %v597_v62 }
 0x123   : > { %v600_v2 = vadd.f32 %v599_v1, %v562_v0 }
 0x125   : > { %601 = vst [vmem:[#allocation3] sm:$0x1] %v600_v2 }
 0x126 PF: > { %p1024_p1 = scmp.ne.s32.totalorder %s1344_s19, 1 }
 0x127   : > { %p1025_p2 = scmp.ne.s32.totalorder (!%p1024_p1), %s1340_s18, 0 }
 0x128   : > { %605 = sbr.rel (%p1024_p1) target bundleno = 565 (0x235), region = 48 }
 0x12d   : > { %609 = sbr.rel (%p1025_p2) target bundleno = 338 (0x152), region = 52 }
 0x132   : > { %v610_v3 = vld [vmem:[#allocation2] sm:$0x1]  ;;  %v612_v4 = vld [vmem:[#allocation3] sm:$0x1] }
 0x133   : > { %v611_v5 = vmul.f32 0.001953125, %v610_v3  ;;  %v613_v6 = vmul.f32 0.001953125, %v612_v4  ;;  %v619_v11 = vld [vmem:[%s1699_s2] sm:$0x1] }
 0x134   : > { %v622_v14 = vld [vmem:[%s1700_s3] sm:$0x1] }
 0x135   : > { %v614_v7 = vmul.f32 %v611_v5, %v611_v5 }
 0x137   : > { %v615_v8 = vsub.f32 %v613_v6, %v614_v7 }
 0x139   : > { %v616_v9 = vmax.f32 %v615_v8, 0.0 }
 0x13b   : > { %v617_v10 = vadd.f32 1e-05, %v616_v9 }
 0x13d   : > { %1251 = vrsqrt.f32 %v617_v10 }
 0x14a   : > { %v1252_v12 = vpop.eup %1251 }
 0x14b   : > { %v620_v13 = vmul.f32 %v1252_v12, %v619_v11 }
 0x14d   : > { %621 = vst [vmem:[#allocation4] sm:$0x1] %v620_v13  ;;  %v623_v15 = vmul.f32 %v620_v13, %v611_v5 }
 0x14f   : > { %v624_v16 = vsub.f32 %v622_v14, %v623_v15 }
 0x151   : > { %625 = vst [vmem:[#allocation5] sm:$0x1] %v624_v16 }
 0x152 PF: > { %v1253_v17 = vld [vmem:[%s1698_s1 + $0x10] sm:$0xff]   ;;  %v1254_v18 = vld [vmem:[%s1698_s1 + $0x8] sm:$0xff]   ;;  %v1255_v19 = vld [vmem:[%s1698_s1] sm:$0xff]   ;;  %vm706_vm2 = vcmask 392192  }
 0x153   : > { %1119 = vmatprep.subr.bf16.mxu0 %v1253_v17  ;;  %1147 = vmatprep.subr.bf16.mxu1 %v1253_v17  ;;  %v1256_v20 = vld [vmem:[%s1467_s14] sm:$0xff]   ;;  %v1258_v22 = vld [vmem:[%s1467_s14 + $0x8] sm:$0xff]   ;;  %v1260_v24 = vld [vmem:[%s1467_s14 + $0x10] sm:$0xff]  }
 0x154   : > { %1120 = vmatpush3.bf16.msra.mxu0 %v1253_v17  ;;  %1150 = vmatpush3.bf16.msra.mxu1 %v1253_v17  ;;  %v1257_v21 = vld [vmem:[%s1467_s14 + $0x20] sm:$0xff]   ;;  %v1259_v23 = vld [vmem:[%s1467_s14 + $0x28] sm:$0xff]   ;;  %v1261_v25 = vld [vmem:[%s1467_s14 + $0x30] sm:$0xff]  }
 0x155   : > { %1121 = vmatprep.subr.bf16.mxu0 %v1254_v18  ;;  %1148 = vmatprep.subr.bf16.mxu1 %v1254_v18  ;;  %v1262_v26 = vld [vmem:[%s1467_s14 + $0x18] sm:$0xff]   ;;  %v1582_v28 = vld [vmem:[#allocation4] ss:$0 sm:$0xff] }
 0x156   : > { %1125 = vmatprep.mubr.msk.bf16.mxu0 %vm706_vm2, %v1256_v20  ;;  %1133 = vmatprep.mubr.msk.bf16.mxu1 %vm706_vm2, %v1257_v21  ;;  %v1263_v27 = vld [vmem:[%s1467_s14 + $0x38] sm:$0xff]  }
 0x158   : > { %1122 = vmatpush3.bf16.msra.mxu0 %v1254_v18  ;;  %1151 = vmatpush3.bf16.msra.mxu1 %v1254_v18  ;;  %v1584_v30 = vld [vmem:[#allocation5] ss:$0 sm:$0xff] }
 0x159   : > { %1123 = vmatprep.subr.bf16.mxu0 %v1255_v19  ;;  %1149 = vmatprep.subr.bf16.mxu1 %v1255_v19 }
 0x15c   : > { %1124 = vmatpush3.bf16.msra.mxu0 %v1255_v19  ;;  %1152 = vmatpush3.bf16.msra.mxu1 %v1255_v19 }
 0x15f   : > { %1126 = vmatmul.mubr.msk.bf16.vlgmr.msra.gmra.mxu0 %vm706_vm2, %v1258_v22  ;;  %1134 = vmatmul.mubr.msk.bf16.vlgmr.msra.gmra.mxu1 %vm706_vm2, %v1259_v23 }
 0x160   : > { %1129 = vmatprep.mubr.msk.bf16.mxu0 %vm706_vm2, %v1260_v24  ;;  %1137 = vmatprep.mubr.msk.bf16.mxu1 %vm706_vm2, %v1261_v25 }
 0x167   : > { %1130 = vmatmul.mubr.msk.bf16.gmra.mxu0 %vm706_vm2, %v1262_v26  ;;  %1138 = vmatmul.mubr.msk.bf16.gmra.mxu1 %vm706_vm2, %v1263_v27 }
 0x21f   : > { %v1127_v29 = vpop.f32.mrf.mxu0  ;;  %v1135_v31 = vpop.f32.mrf.mxu1 }
 0x220   : > { %v837_v32 = vmul.f32 %v1127_v29, %v1582_v28  ;;  %v845_v33 = vmul.f32 %v1135_v31, %v1582_v28 }
 0x221   : > { %v765_v34 = vpop.f32.mrf.mxu0  ;;  %v797_v35 = vpop.f32.mrf.mxu1 }
 0x222   : > { %v860_v36 = vadd.f32 %v1584_v30, %v837_v32  ;;  %v868_v37 = vadd.f32 %v1584_v30, %v845_v33  ;;  %v835_v38 = vmul.f32 %v1582_v28, %v765_v34  ;;  %v843_v39 = vmul.f32 %v1582_v28, %v797_v35 }
 0x223   : > { %v1128_v40 = vpop.f32.mrf.mxu0  ;;  %v1136_v41 = vpop.f32.mrf.mxu1 }
 0x224   : > { %v876_v42 = vmax.f32 %v860_v36, 0.0  ;;  %v884_v43 = vmax.f32 %v868_v37, 0.0  ;;  %v858_v44 = vadd.f32 %v1584_v30, %v835_v38  ;;  %v866_v45 = vadd.f32 %v1584_v30, %v843_v39 }
 0x225   : > { %v838_v46 = vmul.f32 %v1128_v40, %v1582_v28  ;;  %v846_v47 = vmul.f32 %v1136_v41, %v1582_v28  ;;  %v768_v48 = vpop.f32.mrf.mxu0  ;;  %v800_v49 = vpop.f32.mrf.mxu1 }
 0x226   : > { %892 = vst [vmem:[%s1469_s23 + $0x10] sm:$0xff] %v876_v42  ;;  %900 = vst [vmem:[%s1469_s23 + $0x50] sm:$0xff] %v884_v43  ;;  %v874_v50 = vmax.f32 %v858_v44, 0.0  ;;  %v882_v51 = vmax.f32 %v866_v45, 0.0  ;;  %v836_v52 = vmul.f32 %v1582_v28, %v768_v48  ;;  %v844_v53 = vmul.f32 %v1582_v28, %v800_v49 }
 0x227   : > { %v861_v54 = vadd.f32 %v1584_v30, %v838_v46  ;;  %v869_v55 = vadd.f32 %v1584_v30, %v846_v47  ;;  %v1131_v56 = vpop.f32.mrf.mxu0  ;;  %v1139_v57 = vpop.f32.mrf.mxu1 }
 0x228   : > { %890 = vst [vmem:[%s1469_s23] sm:$0xff] %v874_v50  ;;  %898 = vst [vmem:[%s1469_s23 + $0x40] sm:$0xff] %v882_v51  ;;  %v859_v58 = vadd.f32 %v1584_v30, %v836_v52  ;;  %v867_v59 = vadd.f32 %v1584_v30, %v844_v53  ;;  %v841_v60 = vmul.f32 %v1131_v56, %v1582_v28 }
 0x229   : > { %v849_v61 = vmul.f32 %v1139_v57, %v1582_v28  ;;  %v877_v62 = vmax.f32 %v861_v54, 0.0  ;;  %v885_v63 = vmax.f32 %v869_v55, 0.0  ;;  %v781_v0 = vpop.f32.mrf.mxu0  ;;  %v813_v1 = vpop.f32.mrf.mxu1 }
 0x22a   : > { %v875_v2 = vmax.f32 %v859_v58, 0.0  ;;  %v883_v3 = vmax.f32 %v867_v59, 0.0  ;;  %v864_v4 = vadd.f32 %v1584_v30, %v841_v60  ;;  %v839_v6 = vmul.f32 %v1582_v28, %v781_v0 }
 0x22b   : > { %v872_v5 = vadd.f32 %v1584_v30, %v849_v61  ;;  %893 = vst [vmem:[%s1469_s23 + $0x18] sm:$0xff] %v877_v62  ;;  %901 = vst [vmem:[%s1469_s23 + $0x58] sm:$0xff] %v885_v63  ;;  %v847_v7 = vmul.f32 %v1582_v28, %v813_v1  ;;  %v1132_v8 = vpop.f32.mrf.mxu0  ;;  %v1140_v9 = vpop.f32.mrf.mxu1 }
 0x22c   : > { %891 = vst [vmem:[%s1469_s23 + $0x8] sm:$0xff] %v875_v2  ;;  %899 = vst [vmem:[%s1469_s23 + $0x48] sm:$0xff] %v883_v3  ;;  %v880_v10 = vmax.f32 %v864_v4, 0.0  ;;  %v842_v12 = vmul.f32 %v1132_v8, %v1582_v28  ;;  %v850_v13 = vmul.f32 %v1140_v9, %v1582_v28  ;;  %v862_v14 = vadd.f32 %v1584_v30, %v839_v6 }
 0x22d   : > { %v888_v11 = vmax.f32 %v872_v5, 0.0  ;;  %v870_v15 = vadd.f32 %v1584_v30, %v847_v7  ;;  %v784_v16 = vpop.f32.mrf.mxu0  ;;  %v816_v17 = vpop.f32.mrf.mxu1 }
 0x22e   : > { %896 = vst [vmem:[%s1469_s23 + $0x30] sm:$0xff] %v880_v10  ;;  %v865_v18 = vadd.f32 %v1584_v30, %v842_v12  ;;  %v873_v19 = vadd.f32 %v1584_v30, %v850_v13  ;;  %v840_v20 = vmul.f32 %v1582_v28, %v784_v16  ;;  %v848_v21 = vmul.f32 %v1582_v28, %v816_v17 }
 0x22f   : > { %904 = vst [vmem:[%s1469_s23 + $0x70] sm:$0xff] %v888_v11  ;;  %v878_v22 = vmax.f32 %v862_v14, 0.0  ;;  %v886_v23 = vmax.f32 %v870_v15, 0.0 }
 0x230   : > { %v881_v24 = vmax.f32 %v865_v18, 0.0  ;;  %v889_v25 = vmax.f32 %v873_v19, 0.0  ;;  %v863_v26 = vadd.f32 %v1584_v30, %v840_v20  ;;  %v871_v27 = vadd.f32 %v1584_v30, %v848_v21 }
 0x231   : > { %894 = vst [vmem:[%s1469_s23 + $0x20] sm:$0xff] %v878_v22  ;;  %902 = vst [vmem:[%s1469_s23 + $0x60] sm:$0xff] %v886_v23 }
 0x232   : > { %897 = vst [vmem:[%s1469_s23 + $0x38] sm:$0xff] %v881_v24  ;;  %905 = vst [vmem:[%s1469_s23 + $0x78] sm:$0xff] %v889_v25  ;;  %v879_v29 = vmax.f32 %v863_v26, 0.0  ;;  %v887_v31 = vmax.f32 %v871_v27, 0.0 }
 0x234   : > { %895 = vst [vmem:[%s1469_s23 + $0x28] sm:$0xff] %v879_v29  ;;  %903 = vst [vmem:[%s1469_s23 + $0x68] sm:$0xff] %v887_v31 }
 0x235 PF: > { %s914_s14 = smul.u32 %s1340_s18, %s1344_s19  ;;  %s921_s10 = sshll.u32 %s1469_s23, 4  ;;  %s1637_s10 = int_to_ptr.vmem [resolvable:$true] %s921_s10 }
 0x236   : > { %s1646_s27 = scalar_lea.sflag [#allocation7], %s203_s8  ;;  %s1264_s30 = scalar_lea.vmem %s1637_s10, 2048 }
 0x237   : > { %s1052_s11 = sshll.u32 %s914_s14, 11  ;;  %p1265_p3 = scmp.ne.s32.totalorder %s1637_s10, %s1264_s30 }
 0x238   : > { %s1642_s24 = scalar_lea.hbm %s1701_s4, %s1052_s11  ;;  %s1361_s18 = smov [#allocation6]  }
 0x239   : > { %p1266_p4 = pnand %p1265_p3, %p1442_p6  ;;  %s1268_s19 = sshll.u32 %s1361_s18, 4  ;;  %s1269_s19 = int_to_ptr.vmem [resolvable:$false] %s1268_s19 }
 0x23a   : > { %s1270_s23 = scalar_lea.vmem %s1269_s19, 4096  ;;  %p1271_p7 = scmp.lt.s32.totalorder %s1637_s10, %s1269_s19 }
 0x23b   : > { %p1267_p5 = pneg %p1266_p4  ;;  %p1272_p9 = scmp.lt.s32.totalorder %s1270_s23, %s1264_s30 }
 0x23d   : > { %p1273_p10 = por %p1272_p9, %p1271_p7 }
 0x23f   : > { %p1274_p11 = pnand %p1273_p10, %p1267_p5 }
 0x241   : > { %1277 = shalt.err (!%p1274_p11)
}
 0x242   : > { %s1278_s8 = scalar_lea.hbm %s1642_s24, 2048  ;;  %s1282_s9 = scalar_lea.hbm %s1701_s4, 8192 }
 0x243   : > { %p1279_p12 = scmp.ne.s32.totalorder %s1642_s24, %s1278_s8  ;;  %p1283_p1 = scmp.lt.s32.totalorder %s1642_s24, %s1701_s4 }
 0x244   : > { %p1284_p2 = scmp.lt.s32.totalorder %s1282_s9, %s1278_s8 }
 0x245   : > { %p1280_p13 = pnand %p1279_p12, %p1442_p6 }
 0x246   : > { %p1285_p3 = por %p1284_p2, %p1283_p1 }
 0x247   : > { %p1281_p0 = pneg %p1280_p13 }
 0x249   : > { %p1286_p4 = pnand %p1285_p3, %p1281_p0 }
 0x24b   : > { %1289 = shalt.err (!%p1286_p4)
}
 0x24c   : > { %s1362_s12 = smov 128   ;;  %s1363_s13 = smov 8  }
 0x24d   : > { %1153 = dma.vmem_to_hbm [thread:$0]  (%p1442_p6), %s1637_s10, 2048, %s1642_s24, %s1646_s27, %s1362_s12, %s1362_s12, %s1363_s13  }
 0x24e PF: > { %p1159_p5 = scmp.ge.s32.totalorder %s1356_s22, 2  ;;  %s936_s30 = sand.u32 1, %s1328_s15  }
 0x24f   : > { %s937_s18 = scalar_lea.sflag [#allocation7], %s936_s30 }
 0x250   : > { %p1156_p7 = pnand %p1159_p5, %p1449_p8 }
 0x252   : > { %p1157_p9 = pneg %p1156_p7 }
 0x254   : > { %1323 = dma.done.wait (%p1157_p9), %s937_s18, 2048  }
 0x255   : > { %1325 = vsyncadd (%p1157_p9), %s937_s18, 4294965248  ;;  %s17_s22 = sadd.s32 1, %s1356_s22   ;;  %s1704_s15 = smov %s1332_s16 }
 0x256   : > { %p14_p10 = scmp.ge.s32.totalorder %s17_s22, 10   ;;  %s1705_s16 = smov %s1336_s17 }
 0x257   : > { %s1706_s17 = smov %s1458_s7  ;;  %s1707_s18 = smov %s1348_s20 }
 0x258   : > { %s1708_s19 = smov %s1352_s21  ;;  %s1709_s20 = smov %s1712_s25 }
 0x259   : > { %s1710_s21 = smov %s1716_s26  ;;  %16 = sbr.rel (!%p14_p10) target bundleno = 5 (0x5), region = 87 }
 0x25e   :  { %942 = vsyncpa [#allocation7], 1 }
 0x25f   :  { %944 = vsyncpa [#allocation7 + $0x1], 1 }

</bundles_post_ra>
